<compile_context>
chip_gen: v7x
topology: tpu7x:2x2x1
jax: 0.10.0
libtpu: 0.0.40
codegen_flags: <defaults>
</compile_context>

<pallas_src>
import jax
import jax.numpy as jnp
from jax.experimental import pallas as pl
from jax.experimental.pallas import tpu as pltpu


def _embedding_onehot_kernel(idx_ref, table_ref, out_ref):
    """Gather rows of the embedding table via a one-hot MXU matmul.

    idx_ref   : VMEM (TB, 1) int32   indices for this batch tile
    table_ref : VMEM (n, nz)         full embedding table
    out_ref   : VMEM (TB, nz)        gathered embeddings for this tile
    """
    tb, _ = out_ref.shape
    n = table_ref.shape[0]

    idx = idx_ref[...]                                          # (TB, 1) int32
    col = jax.lax.broadcasted_iota(jnp.int32, (tb, n), 1)       # (TB, n)
    one_hot = (col == idx).astype(table_ref.dtype)              # (TB, n)

    # Single MXU op + single (TB, nz) store (no per-row masked stores).
    out_ref[...] = jnp.dot(
        one_hot, table_ref[...], preferred_element_type=jnp.float32
    ).astype(out_ref.dtype)


def embedding_lookup(idx, table, *, block_b=128):
    """Pallas equivalent of nn.Embedding.forward: table[idx] for flat idx (B,)."""
    B = idx.shape[0]
    n, nz = table.shape

    # Batch tiling: one tile at small B; parallel tiles for large B (v7x 2-TC).
    tb = B if B <= block_b else block_b
    if B % tb != 0:               # keep the spec simple: fall back to one tile
        tb = B
    grid = (B // tb,)

    idx2d = idx.astype(jnp.int32).reshape(B, 1)

    cost = pl.CostEstimate(
        flops=2 * B * n * nz,
        transcendentals=0,
        bytes_accessed=B * 4 + n * nz * 4 + B * nz * 4,
    )

    return pl.pallas_call(
        _embedding_onehot_kernel,
        out_shape=jax.ShapeDtypeStruct((B, nz), table.dtype),
        grid=grid,
        in_specs=[
            pl.BlockSpec((tb, 1), lambda i: (i, 0)),     # index tile (VMEM)
            pl.BlockSpec((n, nz), lambda i: (0, 0)),     # full table resident
        ],
        out_specs=pl.BlockSpec((tb, nz), lambda i: (i, 0)),
        compiler_params=pltpu.CompilerParams(
            dimension_semantics=("parallel",)),
        cost_estimate=cost,
    )(idx2d, table)


class NetZ:
    """JAX/Pallas port of the PyTorch `_netZ` module."""

    def __init__(self, nz, n, key):
        self.n = n
        self.nz = nz
        # nn.Embedding default init: weight ~ N(0, 1), shape (n, nz).
        self.weight = jax.random.normal(key, (n, nz), dtype=jnp.float32)

    def get_norm(self):
        # wn = ||W||_2 along dim=1, then W <- W / wn (row-normalize).
        # NOTE: matches PyTorch exactly (no epsilon); all-zero rows would NaN.
        wn = jnp.linalg.norm(self.weight, ord=2, axis=1, keepdims=True)
        self.weight = self.weight / wn

    def forward(self, idx):
        z = embedding_lookup(idx, self.weight)
        # PyTorch .squeeze(): drop all size-1 dims (pure shape glue).
        return jnp.squeeze(z)


if __name__ == "__main__":
    key = jax.random.PRNGKey(0)
    k_w, k_idx = jax.random.split(key)

    nz, n, batch = 32, 64, 8          # small shapes consistent with the module
    net = NetZ(nz, n, k_w)

    idx = jax.random.randint(k_idx, (batch,), 0, n, dtype=jnp.int32)

    z = net.forward(idx)
    z = jax.block_until_ready(z)

    # Reference check against plain JAX gather (same semantics as nn.Embedding).
    ref = jnp.squeeze(net.weight[idx])
    assert z.shape == (batch, nz), z.shape
    assert z.dtype == jnp.float32
    assert bool(jnp.allclose(z, ref, atol=1e-6)), "Pallas embedding gather mismatch"

    # Also exercise get_norm() + forward once more (row-normalized table path).
    net.get_norm()
    z2 = jax.block_until_ready(net.forward(idx))
    ref2 = jnp.squeeze(net.weight[idx])
    assert bool(jnp.allclose(z2, ref2, atol=1e-6)), "mismatch after get_norm"

    print("KERNEL_OK")
</pallas_src>

<mosaic_0001>
module attributes {stable_mosaic.version = 11 : i64} {
  func.func @_embedding_onehot_kernel(%arg0: i32, %arg1: memref<8x1xi32, #tpu.memory_space<vmem>>, %arg2: memref<64x32xf32, #tpu.memory_space<vmem>>, %arg3: memref<8x32xf32, #tpu.memory_space<vmem>>) attributes {dimension_semantics = [#tpu.dimension_semantics<parallel>], iteration_bounds = array<i64: 1>, scalar_prefetch = 0 : i64, scratch_operands = 0 : i64, tpu.core_type = #tpu.core_type<tc>, window_params = [{transform_indices = @transform_0, window_bounds = array<i64: 8, 1>}, {pipeline_mode = #tpu.pipeline_mode<synchronous>, transform_indices = @transform_1, window_bounds = array<i64: 64, 32>}, {transform_indices = @transform_2, window_bounds = array<i64: 8, 32>}]} {
    %c0 = arith.constant 0 : index
    %c0_0 = arith.constant 0 : index
    %0 = vector.load %arg1[%c0, %c0_0] : memref<8x1xi32, #tpu.memory_space<vmem>>, vector<8x1xi32>
    %1 = tpu.iota {dimensions = array<i32: 1>} : vector<8x64xi32>
    %2 = vector.broadcast %0 : vector<8x1xi32> to vector<8x64xi32>
    %3 = arith.cmpi eq, %1, %2 : vector<8x64xi32>
    %4 = arith.extui %3 : vector<8x64xi1> to vector<8x64xi32>
    %5 = arith.sitofp %4 : vector<8x64xi32> to vector<8x64xf32>
    %c0_1 = arith.constant 0 : index
    %c0_2 = arith.constant 0 : index
    %6 = vector.load %arg2[%c0_1, %c0_2] : memref<64x32xf32, #tpu.memory_space<vmem>>, vector<64x32xf32>
    %cst = arith.constant dense<0.000000e+00> : vector<8x32xf32>
    %7 = tpu.matmul %5, %6, %cst {dimension_numbers = #tpu.dot_dimension_numbers<[1], [0], [0], [1], [0, 0, 1, 1], [], []>} : vector<8x64xf32>, vector<64x32xf32>, vector<8x32xf32> -> vector<8x32xf32>
    %c0_3 = arith.constant 0 : index
    %c0_4 = arith.constant 0 : index
    %8 = vector.load %arg3[%c0_3, %c0_4] : memref<8x32xf32, #tpu.memory_space<vmem>>, vector<8x32xf32>
    tpu.vector_store %arg3[%c0_3, %c0_4], %7 {strides = array<i32>} : memref<8x32xf32, #tpu.memory_space<vmem>>, vector<8x32xf32>,
    return
  }
  func.func @transform_0(%arg0: i32) -> (i32, i32) {
    %c0_i32 = arith.constant 0 : i32
    %c0_i32_0 = arith.constant 0 : i32
    return %arg0, %c0_i32 : i32, i32
  }
  func.func @transform_1(%arg0: i32) -> (i32, i32) {
    %c0_i32 = arith.constant 0 : i32
    %c0_i32_0 = arith.constant 0 : i32
    %c0_i32_1 = arith.constant 0 : i32
    return %c0_i32, %c0_i32_0 : i32, i32
  }
  func.func @transform_2(%arg0: i32) -> (i32, i32) {
    %c0_i32 = arith.constant 0 : i32
    %c0_i32_0 = arith.constant 0 : i32
    return %arg0, %c0_i32 : i32, i32
  }
}

</mosaic_0001>

<bundles_post_ra>
// kernel: tpu_custom_call.1
= control target key start
LH: loop header
LB: loop body
LE: loop exit
PB: predicated region body
PF: predicated region fallthrough
CT: control target
= control target key end

     0   :  { %v191_v3 = vmov 0   ;;  %v192_v4 = vmov 0.0|0.0   ;;  %vm193_vm0 = vmmov 0   ;;  %v194_v9 = vmov 0.0   ;;  %s250_s0 = inlined_call_operand.vmem [shape: s32[8,1], index: 0, kind: input, shape index: {}]   ;;  %s251_s1 = inlined_call_operand.vmem [shape: f32[64,32], index: 1, kind: input, shape index: {}]   ;;  %s252_s2 = inlined_call_operand.hbm [shape: f32[8,32], index: 2, kind: output, shape index: {}]  }
   0x1   :  { %v12_v0 = vld [vmem:[%s250_s0] sm:$0xff]  ;;  %v22_v2 = vld [vmem:[%s251_s1 + $0x8] sm:$0xff]  ;;  %166 = vset.pattern.permute.xlu0 %v191_v3  ;;  %149 = vmatprep.subr.bf16.mxu0 %v192_v4  ;;  %v23_v6 = vld [vmem:[%s251_s1 + $0x10] sm:$0xff] }
   0x2   :  { %v21_v1 = vld [vmem:[%s251_s1] sm:$0xff]  ;;  %v24_v7 = vld [vmem:[%s251_s1 + $0x18] sm:$0xff]  ;;  %16 = vperm.xlu0 %166, %v12_v0   ;;  %146 = vmatprep.mubr.msk.f32.mxu0 %vm193_vm0, %v194_v9 }
   0x3   :  { %v150_v5 = vpack.c.bf16 %v22_v2, %v21_v1  ;;  %v153_v8 = vpack.c.bf16 %v24_v7, %v23_v6 }
   0x5   :  { %151 = vmatpush3.bf16.msra.mxu0 %v150_v5 }
   0x6   :  { %7 = vsyncpa [#allocation3], 0  ;;  %152 = vmatprep.subr.bf16.mxu0 %v192_v4  ;;  %v25_v10 = vld [vmem:[%s251_s1 + $0x20] sm:$0xff]  ;;  %v26_v11 = vld [vmem:[%s251_s1 + $0x28] sm:$0xff]  ;;  %v13_v16 = vlaneseq  ;;  %vm29_vm1 = vcmask 523264   ;;  %s195_s26 = smov [#allocation2]  }
   0x7   :  { %v156_v12 = vpack.c.bf16 %v26_v11, %v25_v10  ;;  %v27_v13 = vld [vmem:[%s251_s1 + $0x30] sm:$0xff]  ;;  %v28_v14 = vld [vmem:[%s251_s1 + $0x38] sm:$0xff]  ;;  %s111_s27 = sshll.u32 %s195_s26, 4  ;;  %vm103_vm3 = vcmask 261120   ;;  %s112_s27 = int_to_ptr.vmem [resolvable:$true] %s111_s27 }
   0x8   :  { %v159_v15 = vpack.c.bf16 %v28_v14, %v27_v13  ;;  %v14_v17 = vand.u32 127, %v13_v16  ;;  %s167_s28 = scalar_lea.vmem %s112_s27, 128  ;;  %p172_p1 = scmp.lt.s32.totalorder %s112_s27, %s112_s27 }
   0x9   :  { %154 = vmatpush3.bf16.msra.mxu0 %v153_v8  ;;  %p168_p0 = scmp.ne.s32.totalorder %s112_s27, %s167_s28  ;;  %p173_p2 = scmp.lt.s32.totalorder %s167_s28, %s167_s28 }
   0xa   :  { %155 = vmatprep.subr.bf16.mxu0 %v192_v4 }
   0xb   :  { %p174_p3 = por %p173_p2, %p172_p1 }
   0xd   :  { %157 = vmatpush3.bf16.msra.mxu0 %v156_v12  ;;  %p175_p4 = pnand %p174_p3, %p168_p0 }
   0xe   :  { %158 = vmatprep.subr.bf16.mxu0 %v192_v4 }
  0x11   :  { %160 = vmatpush3.bf16.msra.mxu0 %v159_v15 }
  0x81   :  { %v17_v18 = vpop.permute.xlu0 %16 }
  0x82   :  { %vm18_vm2 = vcmp.eq.s32.totalorder %v14_v17, %v17_v18 }
  0x83   :  { %v119_v19 = vsel %vm18_vm2, 1.0, %v194_v9 }
  0x84   :  { %147 = vmatmul.mubr.msk.f32.vlgmr.msra.gmra.mrb[0].mxu0 %vm29_vm1, %v119_v19 }
 0x157   :  { %v99_v20 = vpop.f32.mrb[0].mxu0 }
 0x158   :  { %104 = vst.msk [vmem:[#allocation2] sm:$0xff] %vm103_vm3, %v99_v20  ;;  %v148_v21 = vpop.f32.mrb[1].mxu0 }
 0x159   :  { %178 = shalt.err (!%p175_p4)
}
 0x15a   :  { %s179_s30 = scalar_lea.hbm %s252_s2, 128 }
 0x15b   :  { %p180_p5 = scmp.ne.s32.totalorder %s252_s2, %s179_s30  ;;  %p183_p6 = scmp.lt.u32.totalorder %s179_s30, %s252_s2 }
 0x15d   :  { %p185_p7 = pnand %p183_p6, %p180_p5 }
 0x15f   :  { %188 = shalt.err (!%p185_p7)
}
 0x160   :  { %114 = dma.vmem_to_hbm [thread:$0]  %s112_s27, 128, %s252_s2, [#allocation3]  }
 0x161   :  { %189 = dma.done.wait [#allocation3], 128  }
 0x162   :  { %190 = vsyncadd [#allocation3], 4294967168 }
 0x163   :  { %118 = vsyncpa [#allocation3], 1 }

</bundles_post_ra>
